<compile_context>
chip_gen: v5e
topology: v5e:2x2
jax: 0.10.0
libtpu: 0.0.40
codegen_flags: <defaults>
</compile_context>

<pallas_src>
import jax
import jax.numpy as jnp
from jax import lax
from jax.experimental import pallas as pl
from jax.experimental.pallas import tpu as pltpu

_LANES = 128


def _make_sin_sum_kernel(tile_rows: int, acc_rows: int, tiles_per_seg: int,
                         total_rows: int, ragged_tile):
    folds = tile_rows // acc_rows

    def _accumulate(tile, o_ref):
        # Per-lane VPU adds only; fold (tile_rows, 128) into (acc_rows, 128)
        # giving acc_rows//8 independent vreg add chains. The cross-lane reduce
        # is deferred to the wrapper.
        part = jnp.sin(tile).reshape(folds, acc_rows, _LANES).sum(axis=0)
        o_ref[...] += part[None, :, :]

    def kernel(x_ref, o_ref):
        s = pl.program_id(0)   # segment axis ("parallel"; feeds both TCs on v7x)
        k = pl.program_id(1)   # tile-within-segment axis ("arbitrary" reduction)

        @pl.when(k == 0)
        def _init():
            o_ref[...] = jnp.zeros_like(o_ref)

        tile = x_ref[...]
        if tile.dtype != jnp.float32:          # static check; no-op for f32 input
            tile = tile.astype(jnp.float32)

        if ragged_tile is None:
            _accumulate(tile, o_ref)
        else:
            gtile = s * tiles_per_seg + k

            @pl.when(gtile != ragged_tile)
            def _fast_path():
                _accumulate(tile, o_ref)

            @pl.when(gtile == ragged_tile)
            def _masked_path():
                # Only the single partial boundary tile pays for iota+cmp+select.
                row0 = gtile * tile_rows
                rid = row0 + lax.broadcasted_iota(jnp.int32, tile.shape, 0)
                masked = jnp.where(rid < total_rows, tile, 0.0)  # mask BEFORE sin
                _accumulate(masked, o_ref)

    return kernel


def sin_sum(x: jax.Array, *, tile_rows: int = 8192, num_segments: int = 2) -> jax.Array:
    """sum(sin(x)) over all elements of x, computed in a Pallas TPU kernel."""
    flat = x.reshape(-1)
    n = int(flat.shape[0])
    if n == 0:
        return jnp.float32(0.0)

    itemsize = jnp.dtype(flat.dtype).itemsize
    sub = 8 * max(1, 4 // itemsize)          # sublane multiple: f32->8, bf16->16, i8->32

    # Small-n fast path: pallas_call launch/step overhead dominates; let XLA fuse it.
    if n < max(2048, 2 * sub * _LANES):
        return jnp.sum(jnp.sin(flat.astype(jnp.float32)))

    # 128-aligned prefix goes through the kernel; the <128-element tail is a
    # tiny scalar reduction in the wrapper (avoids an extra HBM pass from pad).
    tail = n % _LANES
    n_main = n - tail
    rows = n_main // _LANES
    main = flat if tail == 0 else flat[:n_main]
    x2d = main.reshape(rows, _LANES)

    # Accumulator rows: 32 (4 vregs of ILP) when there is enough data, else one vreg.
    acc_rows = max(sub, 32)
    if rows < acc_rows:
        acc_rows = sub

    # Tile rows: multiple of acc_rows, never larger than the array (no oversized blocks).
    tile_rows = max(acc_rows, (min(tile_rows, rows) // acc_rows) * acc_rows)

    num_tiles = pl.cdiv(rows, tile_rows)
    # Exact division across segments: no clamped index map, no wasted masked tiles,
    # no TC load imbalance on v7x.
    num_segments = max(1, min(num_segments, num_tiles))
    while num_tiles % num_segments != 0:
        num_segments -= 1
    tiles_per_seg = num_tiles // num_segments

    ragged_tile = (num_tiles - 1) if (rows % tile_rows != 0) else None

    kernel = _make_sin_sum_kernel(tile_rows, acc_rows, tiles_per_seg, rows, ragged_tile)

    partials = pl.pallas_call(
        kernel,
        out_shape=jax.ShapeDtypeStruct((num_segments, acc_rows, _LANES), jnp.float32),
        grid_spec=pltpu.PrefetchScalarGridSpec(
            num_scalar_prefetch=0,
            grid=(num_segments, tiles_per_seg),
            in_specs=[pl.BlockSpec((tile_rows, _LANES),
                                   lambda s, k: (s * tiles_per_seg + k, 0))],
            out_specs=pl.BlockSpec((1, acc_rows, _LANES), lambda s, k: (s, 0, 0)),
        ),
        compiler_params=pltpu.CompilerParams(
            dimension_semantics=("parallel", "arbitrary"),
        ),
        cost_estimate=pl.CostEstimate(
            flops=18 * n_main,                 # sin lowers to a ~15-25 op VPU polynomial
            transcendentals=n_main,
            bytes_accessed=n_main * itemsize + num_segments * acc_rows * _LANES * 4,
        ),
    )(x2d)

    # Tiny final cross-lane reduce over num_segments * acc_rows * 128 partials.
    total = jnp.sum(partials)
    if tail:
        total = total + jnp.sum(jnp.sin(flat[n_main:].astype(jnp.float32)))
    return total


if __name__ == "__main__":
    # Module has no parameters (empty __init__); forward is sum(sin(x)).
    key = jax.random.PRNGKey(0)
    k1, k2, k3 = jax.random.split(key, 3)
    tests = [
        jax.random.normal(k1, (2, 4, 16, 16), dtype=jnp.float32),   # 2048 elems: single-tile kernel path
        jax.random.normal(k2, (8, 4, 32, 64), dtype=jnp.float32),   # 65536 elems: wide accumulator, big tile
        jax.random.normal(k3, (3, 5, 33, 43), dtype=jnp.float32),   # 21285 elems: 2 segments + ragged tile + lane tail
    ]
    for xt in tests:
        result = jax.block_until_ready(sin_sum(xt))
        expected = jnp.sum(jnp.sin(xt))
        assert jnp.allclose(result, expected, rtol=1e-5, atol=1e-3), (xt.shape, result, expected)
    print("KERNEL_OK")
</pallas_src>

<mosaic_0001>
module attributes {stable_mosaic.version = 11 : i64} {
  func.func @kernel(%arg0: i32, %arg1: i32, %arg2: memref<16x128xf32, #tpu.memory_space<vmem>>, %arg3: memref<1x8x128xf32, #tpu.memory_space<vmem>>) attributes {dimension_semantics = [#tpu.dimension_semantics<parallel>, #tpu.dimension_semantics<arbitrary>], iteration_bounds = array<i64: 1, 1>, scalar_prefetch = 0 : i64, scratch_operands = 0 : i64, tpu.core_type = #tpu.core_type<tc>, window_params = [{transform_indices = @transform_0, window_bounds = array<i64: 16, 128>}, {transform_indices = @transform_1, window_bounds = array<i64: 1, 8, 128>}]} {
    %c0_i32 = arith.constant 0 : i32
    %0 = arith.cmpi eq, %arg1, %c0_i32 : i32
    %1 = arith.extui %0 : i1 to i32
    %c0_i32_0 = arith.constant 0 : i32
    %2 = arith.cmpi ne, %1, %c0_i32_0 : i32
    scf.if %2 {
      %cst_8 = arith.constant 0.000000e+00 : f32
      %11 = vector.broadcast %cst_8 : f32 to vector<1x8x128xf32>
      %c0_9 = arith.constant 0 : index
      %c0_10 = arith.constant 0 : index
      %c0_11 = arith.constant 0 : index
      %12 = vector.load %arg3[%c0_9, %c0_10, %c0_11] : memref<1x8x128xf32, #tpu.memory_space<vmem>>, vector<1x8x128xf32>
      tpu.vector_store %arg3[%c0_9, %c0_10, %c0_11], %11 {strides = array<i32>} : memref<1x8x128xf32, #tpu.memory_space<vmem>>, vector<1x8x128xf32>,
    } else {
    }
    %c0 = arith.constant 0 : index
    %c0_1 = arith.constant 0 : index
    %3 = vector.load %arg2[%c0, %c0_1] : memref<16x128xf32, #tpu.memory_space<vmem>>, vector<16x128xf32>
    %4 = math.sin %3 : vector<16x128xf32>
    %5 = vector.shape_cast %4 : vector<16x128xf32> to vector<2x8x128xf32>
    %cst = arith.constant dense<0.000000e+00> : vector<8x128xf32>
    %6 = vector.multi_reduction <add>, %5, %cst [0] : vector<2x8x128xf32> to vector<8x128xf32>
    %c0_2 = arith.constant 0 : index
    %c0_3 = arith.constant 0 : index
    %c0_4 = arith.constant 0 : index
    %7 = vector.load %arg3[%c0_2, %c0_3, %c0_4] : memref<1x8x128xf32, #tpu.memory_space<vmem>>, vector<1x8x128xf32>
    %8 = vector.shape_cast %6 : vector<8x128xf32> to vector<1x8x128xf32>
    %9 = arith.addf %7, %8 : vector<1x8x128xf32>
    %c0_5 = arith.constant 0 : index
    %c0_6 = arith.constant 0 : index
    %c0_7 = arith.constant 0 : index
    %10 = vector.load %arg3[%c0_5, %c0_6, %c0_7] : memref<1x8x128xf32, #tpu.memory_space<vmem>>, vector<1x8x128xf32>
    tpu.vector_store %arg3[%c0_5, %c0_6, %c0_7], %9 {strides = array<i32>} : memref<1x8x128xf32, #tpu.memory_space<vmem>>, vector<1x8x128xf32>,
    return
  }
  func.func @transform_0(%arg0: i32, %arg1: i32) -> (i32, i32) {
    %c1_i32 = arith.constant 1 : i32
    %0 = arith.muli %arg0, %c1_i32 : i32
    %1 = arith.addi %0, %arg1 : i32
    %c0_i32 = arith.constant 0 : i32
    %c0_i32_0 = arith.constant 0 : i32
    return %1, %c0_i32 : i32, i32
  }
  func.func @transform_1(%arg0: i32, %arg1: i32) -> (i32, i32, i32) {
    %c0_i32 = arith.constant 0 : i32
    %c0_i32_0 = arith.constant 0 : i32
    %c0_i32_1 = arith.constant 0 : i32
    return %arg0, %c0_i32, %c0_i32_0 : i32, i32, i32
  }
}

</mosaic_0001>

<bundles_post_ra>
// kernel: tpu_custom_call.1
= control target key start
LH: loop header
LB: loop body
LE: loop exit
PB: predicated region body
PF: predicated region fallthrough
CT: control target
= control target key end

     0   :  { %6 = vsyncpa [#allocation3], 0  ;;  %s638_s0 = inlined_call_operand.hbm [shape: f32[16,128], index: 0, kind: input, shape index: {}]   ;;  %s639_s1 = inlined_call_operand.hbm [shape: f32[1,8,128], index: 1, kind: output, shape index: {}]  }
   0x1   :  { %7 = vsyncpa [#allocation4], 0  ;;  %s16_s8 = sshll.u32 %s638_s0, 4  ;;  %s439_s9 = smov [#allocation2]   ;;  %s17_s8 = int_to_ptr.hbm [resolvable:$true] %s16_s8 }
   0x2   :  { %s18_s10 = sshll.u32 %s439_s9, 4  ;;  %s440_s11 = smov 128   ;;  %s19_s10 = int_to_ptr.vmem [resolvable:$true] %s18_s10 }
   0x3   :  { %s441_s12 = smov 8  }
   0x4   :  { %24 = dma.hbm_to_vmem [thread:$0]  %s17_s8, 256, %s19_s10, [#allocation3], %s440_s11, %s440_s11, %s441_s12  }
   0x5   :  { %435 = dma.done.wait [#allocation3], 256  }
   0x6   :  { %436 = vsyncadd [#allocation3], 4294967040  ;;  %v463_v0 = vld [vmem:[#allocation2] sm:$0xff]  ;;  %v465_v1 = vld [vmem:[#allocation2 + $0x8] sm:$0xff]  ;;  %v442_v23 = vmov 683565275  }
   0x7   :  { %v38_v2 = vand.u32 2147483647, %v463_v0  ;;  %v41_v3 = vand.u32 2139095040, %v463_v0  ;;  %v193_v4 = vand.u32 2147483647, %v465_v1  ;;  %v196_v5 = vand.u32 2139095040, %v465_v1 }
   0x8   :  { %v443_v25 = vmov 2475754826   ;;  %v444_v27 = vmov 2131351028   ;;  %v445_v29 = vmov 2102212464  }
   0x9   :  { %v42_v6 = vshrl.u32 %v41_v3, 23  ;;  %v45_v7 = vand.u32 8388607, %v38_v2  ;;  %v197_v8 = vshrl.u32 %v196_v5, 23  ;;  %v200_v12 = vand.u32 8388607, %v193_v4 }
   0xa   :  { %v446_v31 = vmov 920167782   ;;  %v447_v40 = vmov 1326507024   ;;  %s449_s0 = smov [#allocation5]   ;;  %s359_s16 = sshll.u32 %s639_s1, 4  ;;  %s360_s16 = int_to_ptr.hbm [resolvable:$true] %s359_s16 }
   0xb   :  { %v369_v9 = vadd.s32 4294967169, %v42_v6  ;;  %v46_v10 = vor.u32 8388608, %v45_v7  ;;  %v372_v11 = vadd.s32 4294967169, %v197_v8  ;;  %v201_v17 = vor.u32 8388608, %v200_v12  ;;  %s357_s13 = sshll.u32 %s449_s0, 4  ;;  %s358_s13 = int_to_ptr.vmem [resolvable:$true] %s357_s13 }
   0xd   :  { %v48_v13 = vadd.s32 1, %v369_v9  ;;  %v203_v14 = vadd.s32 1, %v372_v11  ;;  %v475_v16 = vshll.u32 %v46_v10, 8  ;;  %v485_v34 = vshll.u32 %v201_v17, 8 }
   0xf   :  { %vm49_vm0 = vcmp.gt.s32.totalorder %v48_v13, 0  ;;  %vm204_vm1 = vcmp.gt.s32.totalorder %v203_v14, 0  ;;  %v87_v33 = vand.u32 65535, %v475_v16  ;;  %v88_v38 = vshrl.u32 %v475_v16, 16 }
  0x10   :  { %v50_v15 = vsel %vm49_vm0, %v48_v13, 0  ;;  %v205_v19 = vsel %vm204_vm1, %v203_v14, 0 }
  0x11   :  { %v52_v18 = vand.u32 31, %v50_v15  ;;  %v477_v20 = vshrl.u32 %v50_v15, 5  ;;  %v479_v21 = vand.u32 31, %v205_v19  ;;  %v503_v51 = vshrl.u32 %v205_v19, 5 }
  0x13   :  { %v53_v22 = vsub.s32 32, %v52_v18  ;;  %v55_v24 = vshll.u32 %v442_v23, %v52_v18  ;;  %v58_v26 = vshll.u32 %v443_v25, %v52_v18  ;;  %v61_v28 = vshll.u32 %v444_v27, %v52_v18 }
  0x14   :  { %v64_v30 = vshll.u32 %v445_v29, %v52_v18  ;;  %v67_v32 = vshll.u32 %v446_v31, %v52_v18  ;;  %vm70_vm2 = vcmp.lt.s32.totalorder %v477_v20, 1  ;;  %vm73_vm3 = vcmp.lt.s32.totalorder %v477_v20, 4 }
  0x15   :  { %v56_v35 = vshrl.u32 %v443_v25, %v53_v22  ;;  %v59_v36 = vshrl.u32 %v444_v27, %v53_v22  ;;  %v62_v37 = vshrl.u32 %v445_v29, %v53_v22  ;;  %v65_v39 = vshrl.u32 %v446_v31, %v53_v22 }
  0x16   :  { %v68_v41 = vshrl.u32 %v447_v40, %v53_v22  ;;  %v494_v45 = vsub.s32 32, %v479_v21  ;;  %v54_v46 = vshrl.u32 %v442_v23, %v53_v22  ;;  %vm72_vm4 = vcmp.lt.s32.totalorder %v477_v20, 3 }
  0x17   :  { %v57_v42 = vor.u32 %v56_v35, %v55_v24  ;;  %v60_v43 = vor.u32 %v59_v36, %v58_v26  ;;  %v63_v44 = vor.u32 %v62_v37, %v61_v28  ;;  %v66_v47 = vor.u32 %v65_v39, %v64_v30 }
  0x18   :  { %v69_v48 = vor.u32 %v68_v41, %v67_v32  ;;  %vm71_vm5 = vcmp.lt.s32.totalorder %v477_v20, 2  ;;  %v210_v54 = vshll.u32 %v442_v23, %v479_v21  ;;  %v213_v55 = vshll.u32 %v443_v25, %v479_v21 }
  0x19   :  { %v78_v49 = vsel %vm70_vm2, %v57_v42, %v60_v43  ;;  %v82_v50 = vsel %vm70_vm2, %v60_v43, %v63_v44  ;;  %v79_v52 = vsel %vm73_vm3, %v66_v47, 920167782  ;;  %v75_v56 = vsel %vm73_vm3, %v63_v44, 2102212464 }
  0x1a   :  { %v83_v53 = vsel %vm73_vm3, %v69_v48, 1326507024  ;;  %v80_v57 = vsel %vm72_vm4, %v63_v44, %v79_v52  ;;  %v211_v59 = vshrl.u32 %v443_v25, %v494_v45  ;;  %v74_v60 = vsel %vm70_vm2, %v54_v46, %v57_v42 }
  0x1b   :  { %v84_v58 = vsel %vm72_vm4, %v66_v47, %v83_v53  ;;  %v81_v61 = vsel %vm71_vm5, %v78_v49, %v80_v57  ;;  %v214_v63 = vshrl.u32 %v444_v27, %v494_v45  ;;  %v76_v8 = vsel %vm72_vm4, %v60_v43, %v75_v56 }
  0x1c   :  { %v85_v62 = vsel %vm71_vm5, %v82_v50, %v84_v58  ;;  %v111_v6 = vand.u32 65535, %v81_v61  ;;  %v112_v7 = vshrl.u32 %v81_v61, 16  ;;  %v528_v9 = vor.u32 %v211_v59, %v210_v54 }
  0x1d   :  { %v89_v3 = vand.u32 65535, %v85_v62  ;;  %v90_v5 = vshrl.u32 %v85_v62, 16  ;;  %v530_v10 = vor.u32 %v214_v63, %v213_v55  ;;  %v216_v11 = vshll.u32 %v444_v27, %v479_v21 }
  0x1e   :  { %v217_v15 = vshrl.u32 %v445_v29, %v494_v45  ;;  %v113_v18 = vmul.u32 %v111_v6, %v87_v33  ;;  %v114_v19 = vmul.u32 %v112_v7, %v87_v33  ;;  %v115_v22 = vmul.u32 %v111_v6, %v88_v38 }
  0x1f   :  { %v91_v12 = vmul.u32 %v89_v3, %v87_v33  ;;  %v92_v13 = vmul.u32 %v90_v5, %v87_v33  ;;  %v93_v14 = vmul.u32 %v89_v3, %v88_v38  ;;  %v94_v17 = vmul.u32 %v90_v5, %v88_v38 }
  0x20   :  { %v116_v28 = vmul.u32 %v112_v7, %v88_v38  ;;  %v117_v32 = vshll.u32 %v114_v19, 16  ;;  %v118_v35 = vshrl.u32 %v114_v19, 16  ;;  %v119_v36 = vshll.u32 %v115_v22, 16 }
  0x21   :  { %v95_v24 = vshll.u32 %v92_v13, 16  ;;  %v96_v25 = vshrl.u32 %v92_v13, 16  ;;  %v97_v26 = vshll.u32 %v93_v14, 16  ;;  %v98_v30 = vshrl.u32 %v93_v14, 16 }
  0x22   :  { %v120_v37 = vshrl.u32 %v115_v22, 16  ;;  %v219_v39 = vshll.u32 %v445_v29, %v479_v21  ;;  %v448_v41 = vmov 0   ;;  %vm121_vm7 = vc.u32 %v113_v18, %v117_v32 }
  0x23   :  { %vm99_vm6 = vc.u32 %v91_v12, %v95_v24  ;;  %v101_v27 = vadd.s32 %v95_v24, %v91_v12  ;;  %v123_v33 = vadd.s32 %v117_v32, %v113_v18  ;;  %v220_v43 = vshrl.u32 %v446_v31, %v494_v45 }
  0x24   :  { %v100_v42 = vsel %vm99_vm6, 1, %v448_v41  ;;  %v122_v38 = vsel %vm121_vm7, 1, %v448_v41  ;;  %v222_v46 = vshll.u32 %v446_v31, %v479_v21  ;;  %v218_v29 = vor.u32 %v217_v15, %v216_v11 }
  0x25   :  { %v102_v44 = vadd.s32 %v100_v42, %v94_v17  ;;  %vm103_vm8 = vc.u32 %v101_v27, %v97_v26  ;;  %v124_v48 = vadd.s32 %v122_v38, %v116_v28  ;;  %vm125_vm9 = vc.u32 %v123_v33, %v119_v36 }
  0x26   :  { %v104_v47 = vsel %vm103_vm8, 1, %v448_v41  ;;  %v126_v50 = vsel %vm125_vm9, 1, %v448_v41  ;;  %v221_v52 = vor.u32 %v220_v43, %v219_v39  ;;  %v223_v53 = vshrl.u32 %v447_v40, %v494_v45 }
  0x27   :  { %v106_v49 = vadd.s32 %v104_v47, %v102_v44  ;;  %v547_v54 = vadd.s32 %v123_v33, %v119_v36  ;;  %v128_v55 = vadd.s32 %v126_v50, %v124_v48  ;;  %vm225_vm10 = vcmp.lt.s32.totalorder %v503_v51, 1 }
  0x28   :  { %vm227_vm11 = vcmp.lt.s32.totalorder %v503_v51, 3  ;;  %v224_v31 = vor.u32 %v223_v53, %v222_v46  ;;  %vm226_vm12 = vcmp.lt.s32.totalorder %v503_v51, 2  ;;  %vm228_vm13 = vcmp.lt.s32.totalorder %v503_v51, 4 }
  0x29   :  { %v107_v21 = vadd.s32 %v106_v49, %v96_v25  ;;  %v77_v56 = vsel %vm71_vm5, %v74_v60, %v76_v8  ;;  %v129_v57 = vadd.s32 %v128_v55, %v118_v35  ;;  %v233_v40 = vsel %vm225_vm10, %v528_v9, %v530_v10 }
  0x2a   :  { %v234_v58 = vsel %vm228_vm13, %v221_v52, 920167782  ;;  %v237_v62 = vsel %vm225_vm10, %v530_v10, %v218_v29  ;;  %v242_v20 = vand.u32 65535, %v485_v34  ;;  %v238_v3 = vsel %vm228_vm13, %v224_v31, 1326507024 }
  0x2b   :  { %v561_v59 = vadd.s32 %v107_v21, %v98_v30  ;;  %v235_v61 = vsel %vm227_vm11, %v218_v29, %v234_v58  ;;  %v130_v60 = vadd.s32 %v129_v57, %v120_v37  ;;  %v243_v5 = vshrl.u32 %v485_v34, 16 }
  0x2c   :  { %v236_v63 = vsel %vm226_vm12, %v233_v40, %v235_v61  ;;  %v131_v6 = vmul.u32 %v475_v16, %v77_v56  ;;  %v239_v7 = vsel %vm227_vm11, %v221_v52, %v238_v3  ;;  %v209_v18 = vshrl.u32 %v442_v23, %v494_v45 }
  0x2d   :  { %vm133_vm14 = vc.u32 %v561_v59, %v547_v54  ;;  %v266_v8 = vand.u32 65535, %v236_v63  ;;  %v134_v11 = vadd.s32 1, %v130_v60  ;;  %v240_v12 = vsel %vm226_vm12, %v237_v62, %v239_v7 }
  0x2e   :  { %v267_v13 = vshrl.u32 %v236_v63, 16  ;;  %v244_v14 = vand.u32 65535, %v240_v12  ;;  %v245_v15 = vshrl.u32 %v240_v12, 16  ;;  %v230_v35 = vsel %vm228_vm13, %v218_v29, 2102212464 }
  0x2f   :  { %v135_v17 = vsel %vm133_vm14, %v134_v11, %v130_v60  ;;  %v270_v16 = vmul.u32 %v266_v8, %v243_v5  ;;  %v268_v26 = vmul.u32 %v266_v8, %v242_v20  ;;  %v229_v37 = vsel %vm225_vm10, %v209_v18, %v528_v9 }
  0x30   :  { %v269_v19 = vmul.u32 %v267_v13, %v242_v20  ;;  %v136_v22 = vadd.s32 %v135_v17, %v131_v6  ;;  %v246_v24 = vmul.u32 %v244_v14, %v242_v20  ;;  %v247_v25 = vmul.u32 %v245_v15, %v242_v20 }
  0x31   :  { %v248_v28 = vmul.u32 %v244_v14, %v243_v5  ;;  %v249_v36 = vmul.u32 %v245_v15, %v243_v5  ;;  %v271_v23 = vmul.u32 %v267_v13, %v243_v5  ;;  %v274_v45 = vshll.u32 %v270_v16, 16 }
  0x32   :  { %v272_v30 = vshll.u32 %v269_v19, 16  ;;  %v137_v32 = vadd.s32 536870912, %v136_v22  ;;  %v250_v27 = vshll.u32 %v247_v25, 16  ;;  %v231_v43 = vsel %vm227_vm11, %v530_v10, %v230_v35 }
  0x33   :  { %v252_v39 = vshll.u32 %v248_v28, 16  ;;  %v251_v9 = vshrl.u32 %v247_v25, 16  ;;  %v273_v49 = vshrl.u32 %v269_v19, 16  ;;  %v253_v53 = vshrl.u32 %v248_v28, 16 }
  0x34   :  { %v588_v42 = vshrl.u32 %v137_v32, 30  ;;  %vm254_vm15 = vc.u32 %v246_v24, %v250_v27  ;;  %v256_v33 = vadd.s32 %v250_v27, %v246_v24  ;;  %vm276_vm0 = vc.u32 %v268_v26, %v272_v30 }
  0x35   :  { %v255_v44 = vsel %vm254_vm15, 1, %v448_v41  ;;  %v277_v38 = vsel %vm276_vm0, 1, %v448_v41  ;;  %v278_v46 = vadd.s32 %v272_v30, %v268_v26  ;;  %v275_v21 = vshrl.u32 %v270_v16, 16 }
  0x36   :  { %v139_v47 = vshll.u32 %v588_v42, 30  ;;  %v257_v48 = vadd.s32 %v255_v44, %v249_v36  ;;  %vm258_vm1 = vc.u32 %v256_v33, %v252_v39  ;;  %v279_v50 = vadd.s32 %v277_v38, %v271_v23 }
  0x37   :  { %v259_v29 = vsel %vm258_vm1, 1, %v448_v41  ;;  %vm280_vm2 = vc.u32 %v278_v46, %v274_v45  ;;  %v282_v40 = vadd.s32 %v278_v46, %v274_v45  ;;  %v232_v58 = vsel %vm226_vm12, %v229_v37, %v231_v43 }
  0x38   :  { %v140_v52 = vsub.s32 %v136_v22, %v139_v47  ;;  %v261_v55 = vadd.s32 %v259_v29, %v257_v48  ;;  %v281_v10 = vsel %vm280_vm2, 1, %v448_v41  ;;  %v286_v3 = vmul.u32 %v485_v34, %v232_v58 }
  0x39   :  { %v283_v31 = vadd.s32 %v281_v10, %v279_v50  ;;  %v132_v41 = vadd.s32 %v547_v54, %v561_v59  ;;  %vm40_vm7 = vcmp.lt.s32.totalorder %v463_v0, 0  ;;  %vm606_vm8 = vcmp.le.f32.partialorder %v38_v2, 0.7853982 }
  0x3a   :  { %vm141_vm3 = vcmp.lt.s32.totalorder %v140_v52, 0  ;;  %v142_v56 = vsub.s32 0, %v140_v52  ;;  %v262_v57 = vadd.s32 %v261_v55, %v251_v9  ;;  %v162_v55 = vsub.s32 4, %v588_v42 }
  0x3b   :  { %v284_v61 = vadd.s32 %v283_v31, %v273_v49  ;;  %vm195_vm10 = vcmp.lt.s32.totalorder %v465_v1, 0  ;;  %vm622_vm11 = vcmp.le.f32.partialorder %v193_v4, 0.7853982  ;;  %vm181_vm0 = vweird.f32 %v463_v0 }
  0x3c   :  { %v143_v62 = vsel %vm141_vm3, %v142_v56, %v140_v52  ;;  %v263_v20 = vadd.s32 %v262_v57, %v253_v53  ;;  %v163_v57 = vsel %vm40_vm7, %v162_v55, %v588_v42  ;;  %vm336_vm3 = vweird.f32 %v465_v1 }
  0x3d   :  { %v144_v60 = vclz %v143_v62  ;;  %v285_v63 = vadd.s32 %v284_v61, %v275_v21 }
  0x3e   :  { %vm288_vm4 = vc.u32 %v263_v20, %v282_v40  ;;  %v287_v23 = vadd.s32 %v282_v40, %v263_v20 }
  0x3f   :  { %v370_v5 = vadd.s32 4294967294, %v144_v60  ;;  %v289_v6 = vadd.s32 1, %v285_v63  ;;  %v165_v60 = vsel %vm606_vm8, 0, %v163_v57 }
  0x41   :  { %vm371_vm5 = vcmp.lt.s32.totalorder %v370_v5, 0  ;;  %v290_v7 = vsel %vm288_vm4, %v289_v6, %v285_v63 }
  0x42   :  { %v147_v8 = vsel %vm371_vm5, 0, %v370_v5  ;;  %v291_v11 = vadd.s32 %v290_v7, %v286_v3  ;;  %v182_v7 = vadd.s32 3, %v165_v60 }
  0x43   :  { %v148_v12 = vsub.s32 32, %v147_v8  ;;  %v149_v51 = vshll.u32 %v140_v52, %v147_v8  ;;  %v152_v13 = vsub.s32 4294967266, %v147_v8 }
  0x44   :  { %v292_v14 = vadd.s32 536870912, %v291_v11 }
  0x45   :  { %v150_v15 = vshrl.u32 %v132_v41, %v148_v12  ;;  %v153_v17 = vadd.s32 127, %v152_v13 }
  0x46   :  { %v293_v18 = vshrl.u32 %v292_v14, 30 }
  0x47   :  { %v151_v19 = vor.u32 %v150_v15, %v149_v51  ;;  %v154_v16 = vshll.u32 %v153_v17, 23  ;;  %v183_v15 = vand.u32 3, %v182_v7 }
  0x48   :  { %v294_v34 = vshll.u32 %v293_v18, 30  ;;  %v317_v40 = vsub.s32 4, %v293_v18 }
  0x49   :  { %v155_v22 = vor.u32 4788187, %v154_v16  ;;  %v158_v24 = vcvt.s32.f32 %v151_v19  ;;  %vm185_vm12 = vcmp.eq.s32.totalorder %v183_v15, 0  ;;  %vm188_vm13 = vcmp.eq.s32.totalorder %v183_v15, 2 }
  0x4a   :  { %v295_v25 = vsub.s32 %v291_v11, %v294_v34  ;;  %v318_v3 = vsel %vm195_vm10, %v317_v40, %v293_v18  ;;  %vm184_vm14 = vcmp.lt.s32.totalorder %v183_v15, 2 }
  0x4b   :  { %v156_v26 = vand.u32 2147483647, %v155_v22  ;;  %v320_v4 = vsel %vm622_vm11, 0, %v318_v3 }
  0x4c   :  { %vm296_vm6 = vcmp.lt.s32.totalorder %v295_v25, 0  ;;  %v297_v54 = vsub.s32 0, %v295_v25  ;;  %v337_v17 = vadd.s32 3, %v320_v4 }
  0x4d   :  { %v159_v59 = vmul.f32 %v158_v24, %v156_v26 }
  0x4e   :  { %v298_v28 = vsel %vm296_vm6, %v297_v54, %v295_v25 }
  0x4f   :  { %v160_v32 = vxor.u32 2147483648, %v159_v59  ;;  %v299_v35 = vclz %v298_v28 }
  0x51   :  { %v161_v36 = vsel %vm40_vm7, %v160_v32, %v159_v59  ;;  %v373_v27 = vadd.s32 4294967294, %v299_v35 }
  0x52   :  { %v164_v37 = vsel %vm606_vm8, %v463_v0, %v161_v36 }
  0x53   :  { %v166_v39 = vmul.f32 %v164_v37, %v164_v37  ;;  %vm374_vm9 = vcmp.lt.s32.totalorder %v373_v27, 0 }
  0x54   :  { %v302_v45 = vsel %vm374_vm9, 0, %v373_v27 }
  0x55   :  { %v174_v33 = vmul.f32 -0.00019511016, %v166_v39  ;;  %v303_v43 = vsub.s32 32, %v302_v45  ;;  %v304_v2 = vshll.u32 %v295_v25, %v302_v45  ;;  %v167_v44 = vmul.f32 -0.001358992, %v166_v39 }
  0x56   :  { %v307_v38 = vsub.s32 4294967266, %v302_v45  ;;  %v338_v25 = vand.u32 3, %v337_v17 }
  0x57   :  { %v175_v46 = vadd.f32 0.008332121, %v174_v33  ;;  %v305_v47 = vshrl.u32 %v287_v23, %v303_v43  ;;  %v168_v29 = vadd.f32 0.041655596, %v167_v44 }
  0x58   :  { %v308_v9 = vadd.s32 127, %v307_v38  ;;  %vm343_vm15 = vcmp.eq.s32.totalorder %v338_v25, 2  ;;  %vm340_vm1 = vcmp.eq.s32.totalorder %v338_v25, 0  ;;  %vm339_vm2 = vcmp.lt.s32.totalorder %v338_v25, 2 }
  0x59   :  { %v306_v48 = vor.u32 %v305_v47, %v304_v2  ;;  %v176_v49 = vmul.f32 %v175_v46, %v166_v39  ;;  %v169_v10 = vmul.f32 %v168_v29, %v166_v39 }
  0x5a   :  { %v309_v50 = vshll.u32 %v308_v9, 23 }
  0x5b   :  { %v313_v53 = vcvt.s32.f32 %v306_v48  ;;  %v177_v21 = vadd.f32 -0.16666654, %v176_v49  ;;  %v170_v58 = vadd.f32 -0.4999988, %v169_v10 }
  0x5c   :  { %v310_v52 = vor.u32 4788187, %v309_v50 }
  0x5d   :  { %v178_v61 = vmul.f32 %v177_v21, %v166_v39  ;;  %v171_v5 = vmul.f32 %v170_v58, %v166_v39 }
  0x5e   :  { %v311_v31 = vand.u32 2147483647, %v310_v52 }
  0x5f   :  { %v179_v6 = vadd.f32 1.0, %v178_v61  ;;  %v172_v12 = vadd.f32 1.0, %v171_v5 }
  0x60   :  { %v314_v56 = vmul.f32 %v313_v53, %v311_v31 }
  0x61   :  { %v180_v51 = vmul.f32 %v179_v6, %v164_v37  ;;  %v189_v34 = vxor.u32 2147483648, %v172_v12 }
  0x62   :  { %v315_v20 = vxor.u32 2147483648, %v314_v56 }
  0x63   :  { %v186_v16 = vxor.u32 2147483648, %v180_v51  ;;  %v190_v28 = vsel %vm188_vm13, %v189_v34, %v180_v51 }
  0x64   :  { %v316_v63 = vsel %vm195_vm10, %v315_v20, %v314_v56 }
  0x65   :  { %v319_v42 = vsel %vm622_vm11, %v465_v1, %v316_v63  ;;  %v187_v59 = vsel %vm185_vm12, %v172_v12, %v186_v16 }
  0x66   :  { %v321_v41 = vmul.f32 %v319_v42, %v319_v42  ;;  %v191_v27 = vsel %vm184_vm14, %v187_v59, %v190_v28 }
  0x67   :  { %v192_v23 = vsel %vm181_vm0, nan, %v191_v27 }
  0x68   :  { %v322_v8 = vmul.f32 -0.001358992, %v321_v41  ;;  %v329_v11 = vmul.f32 -0.00019511016, %v321_v41 }
  0x6a   :  { %v323_v13 = vadd.f32 0.041655596, %v322_v8  ;;  %v330_v14 = vadd.f32 0.008332121, %v329_v11 }
  0x6c   :  { %v324_v18 = vmul.f32 %v323_v13, %v321_v41  ;;  %v331_v19 = vmul.f32 %v330_v14, %v321_v41 }
  0x6e   :  { %v325_v22 = vadd.f32 -0.4999988, %v324_v18  ;;  %v332_v24 = vadd.f32 -0.16666654, %v331_v19 }
  0x70   :  { %v326_v26 = vmul.f32 %v325_v22, %v321_v41  ;;  %v333_v54 = vmul.f32 %v332_v24, %v321_v41 }
  0x72   :  { %v327_v30 = vadd.f32 1.0, %v326_v26  ;;  %v334_v32 = vadd.f32 1.0, %v333_v54 }
  0x74   :  { %v335_v35 = vmul.f32 %v334_v32, %v319_v42  ;;  %v344_v36 = vxor.u32 2147483648, %v327_v30 }
  0x76   :  { %v341_v37 = vxor.u32 2147483648, %v335_v35  ;;  %v345_v39 = vsel %vm343_vm15, %v344_v36, %v335_v35 }
  0x78   :  { %v342_v45 = vsel %vm340_vm1, %v327_v30, %v341_v37 }
  0x79   :  { %v346_v33 = vsel %vm339_vm2, %v342_v45, %v345_v39 }
  0x7a   :  { %v347_v43 = vsel %vm336_vm3, nan, %v346_v33 }
  0x7b   :  { %v348_v2 = vadd.f32 %v347_v43, %v192_v23 }
  0x7d   :  { %351 = vst [vmem:[#allocation5] sm:$0xff] %v348_v2 }
  0x7e   :  { %362 = dma.vmem_to_hbm [thread:$0]  %s358_s13, 128, %s360_s16, [#allocation4]  }
  0x7f   :  { %437 = dma.done.wait [#allocation4], 128  }
  0x80   :  { %438 = vsyncadd [#allocation4], 4294967168 }
  0x81   :  { %367 = vsyncpa [#allocation3], 1 }
  0x82   :  { %368 = vsyncpa [#allocation4], 1 }

</bundles_post_ra>
